<compile_context>
chip_gen: v5e
topology: v5e:2x2
jax: 0.10.0
libtpu: 0.0.40
codegen_flags: <defaults>
</compile_context>

<pallas_src>
import jax
import jax.numpy as jnp
from jax.experimental import pallas as pl
from jax.experimental.pallas import tpu as pltpu

EPS = 1e-5  # BatchNorm2d default eps


# ----------------------------------------------------------------------------
# Small helpers
# ----------------------------------------------------------------------------
def _vmem_limit_bytes():
    # Per-generation scoped-VMEM budget (v5e/v6e: 128 MiB physical, v7x: 64 MiB),
    # with headroom for Pallas' double-buffered input/output blocks.
    try:
        cap = int(pltpu.get_tpu_info().vmem_capacity_bytes)
    except Exception:  # conservative fallback if the query is unavailable
        cap = 64 * 1024 * 1024
    return min(cap // 2, 64 * 1024 * 1024)


def _lane_shift(x, off):
    """y[..., i] = x[..., (i + off) % P]  (wrapped entries are masked by the caller).

    Implemented as static-slice concatenate so the wrap direction is unambiguous;
    Mosaic lowers it to lane rotates (XLU slot), leaving the VALU/store slots free.
    """
    if off == 0:
        return x
    p = x.shape[-1]
    off %= p
    return jnp.concatenate([x[..., off:], x[..., :off]], axis=-1)


def _and_masks(a, b):
    if a is None:
        return b
    if b is None:
        return a
    return a & b


def _tree_sum(terms):
    """Balanced-tree add so the 4 VALUs are not serialized on one dependency chain."""
    terms = list(terms)
    while len(terms) > 1:
        nxt = [terms[i] + terms[i + 1] for i in range(0, len(terms) - 1, 2)]
        if len(terms) % 2:
            nxt.append(terms[-1])
        terms = nxt
    return terms[0]


def _pos_grid(n_img, hh, ww):
    # (2, n*hh*ww) int32: row 0 = h index, row 1 = w index of each flattened pixel.
    hpos = jnp.broadcast_to(jnp.arange(hh, dtype=jnp.int32)[None, :, None], (n_img, hh, ww))
    wpos = jnp.broadcast_to(jnp.arange(ww, dtype=jnp.int32)[None, None, :], (n_img, hh, ww))
    return jnp.stack([hpos.reshape(-1), wpos.reshape(-1)], axis=0)


# ----------------------------------------------------------------------------
# Fused BottleNeck kernel builder
# ----------------------------------------------------------------------------
def _make_bottleneck_kernel(*, cin, exp, cout, n_img, h, w, s, has_shortcut):
    pad = (s + 1) // 2                        # == 1 for s in {1, 2}
    ho = (h + 2 * pad - 3) // s + 1
    wo = (w + 2 * pad - 3) // s + 1
    p_in = n_img * h * w                      # pixels/channel at input resolution
    p_out = n_img * ho * wo                   # pixels/channel at output resolution
    inv_m1 = 1.0 / float(p_in)
    inv_m2 = 1.0 / float(p_out)

    def bn(y, inv_cnt, gamma, beta, *, relu):
        # Train-mode BatchNorm over the flattened pixel axis.  Two-pass mean / centered
        # variance (avoids E[x^2]-mean^2 cancellation); affine folded to one scale/shift.
        mean = jnp.sum(y, axis=1, keepdims=True) * inv_cnt
        c = y - mean
        var = jnp.sum(c * c, axis=1, keepdims=True) * inv_cnt
        out = c * (gamma * jax.lax.rsqrt(var + EPS)) + beta
        return jnp.clip(out, 0.0, 6.0) if relu else out

    def kernel(*args):
        if has_shortcut:
            (x_ref, pos_ref, w1_ref, w2_ref, w3_ref,
             pp1_ref, pp3_ref, wsc_ref, o_ref) = args
        else:
            (x_ref, pos_ref, w1_ref, w2_ref, w3_ref,
             pp1_ref, pp3_ref, o_ref) = args
            wsc_ref = None

        x = x_ref[...]                                     # (cin, p_in) f32
        x_bf = x.astype(jnp.bfloat16)                      # MXU operand
        pp1 = pp1_ref[...]                                 # (exp, 6): b1 g1 be1 b2 g2 be2
        pp3 = pp3_ref[...]                                 # (cout, 3|6): b3 g3 be3 [bsc gsc besc]
        w2v = w2_ref[...]                                  # (exp, 9) depthwise weights, f32

        # ---- conv1 (1x1) on the MXU + BN1 + ReLU6 ---------------------------
        y1 = jnp.dot(w1_ref[...], x_bf, preferred_element_type=jnp.float32)
        y1 = y1 + pp1[:, 0:1]                              # conv1 bias
        h1 = bn(y1, inv_m1, pp1[:, 1:2], pp1[:, 2:3], relu=True)

        # ---- depthwise 3x3, stride s: lane-shifted taps + border masks ------
        hpos = pos_ref[0:1, :]                             # (1, P) int32 positions
        wpos = pos_ref[1:2, :]
        terms = []
        if s == 1:
            h_ok = {-1: hpos >= 1, 0: None, 1: hpos <= h - 2}
            w_ok = {-1: wpos >= 1, 0: None, 1: wpos <= w - 2}
            for kh in range(3):
                for kw in range(3):
                    dh, dw = kh - 1, kw - 1
                    tap = _lane_shift(h1, dh * w + dw)
                    m = _and_masks(h_ok[dh], w_ok[dw])
                    if m is not None:
                        tap = jnp.where(m, tap, 0.0)
                    terms.append(w2v[:, 3 * kh + kw:3 * kh + kw + 1] * tap)
        else:
            # h1 is quadrant-stacked: quadrant q = hpar*2 + wpar occupies lanes
            # [q*p_out, (q+1)*p_out) and holds input pixels (2*oh + hpar, 2*ow + wpar).
            oh_ok = hpos >= 1
            ow_ok = wpos >= 1
            for kh in range(3):
                for kw in range(3):
                    q = (0 if kh == 1 else 2) + (0 if kw == 1 else 1)
                    dh = -1 if kh == 0 else 0
                    dw = -1 if kw == 0 else 0
                    quad = h1[:, q * p_out:(q + 1) * p_out]
                    tap = _lane_shift(quad, dh * wo + dw)
                    m = _and_masks(oh_ok if dh == -1 else None,
                                   ow_ok if dw == -1 else None)
                    if m is not None:
                        tap = jnp.where(m, tap, 0.0)
                    terms.append(w2v[:, 3 * kh + kw:3 * kh + kw + 1] * tap)
        acc2 = _tree_sum(terms) + pp1[:, 3:4]              # + conv2 bias
        h2 = bn(acc2, inv_m2, pp1[:, 4:5], pp1[:, 5:6], relu=True)

        # ---- conv3 (1x1) on the MXU + BN3 (linear before the residual) ------
        y3 = jnp.dot(w3_ref[...], h2.astype(jnp.bfloat16),
                     preferred_element_type=jnp.float32)
        y3 = bn(y3 + pp3[:, 0:1], inv_m2, pp3[:, 1:2], pp3[:, 2:3], relu=False)

        # ---- shortcut --------------------------------------------------------
        if has_shortcut:
            # stride-2 1x1 conv samples (2*oh, 2*ow) == the (even, even) quadrant q=0.
            x_sc = x_bf[:, 0:p_out] if s == 2 else x_bf
            sc = jnp.dot(wsc_ref[...], x_sc, preferred_element_type=jnp.float32)
            sc = bn(sc + pp3[:, 3:4], inv_m2, pp3[:, 4:5], pp3[:, 5:6], relu=False)
        else:
            sc = x                                         # identity (s == 1, cin == cout)

        o_ref[...] = jnp.clip(y3 + sc, 0.0, 6.0).astype(o_ref.dtype)

    return kernel, ho, wo


# ----------------------------------------------------------------------------
# pallas_call wrapper (one fused call per BottleNeck)
# ----------------------------------------------------------------------------
def bottleneck_pallas(p, x_cnhw, *, s):
    assert s in (1, 2)
    cin, n_img, h, w = x_cnhw.shape
    exp = p["w1"].shape[0]
    cout = p["w3"].shape[0]
    has_shortcut = p["has_shortcut"]

    kernel, ho, wo = _make_bottleneck_kernel(
        cin=cin, exp=exp, cout=cout, n_img=n_img, h=h, w=w, s=s,
        has_shortcut=has_shortcut)
    p_out = n_img * ho * wo

    if s == 2:
        assert h % 2 == 0 and w % 2 == 0
        # Pure relayout of the raw input into its 4 spatial parity quadrants so every
        # stride-2 depthwise tap becomes a small lane shift inside the kernel.
        quads = jnp.stack([x_cnhw[:, :, hp::2, wp::2]
                           for hp in range(2) for wp in range(2)], axis=1)
        x_in = quads.reshape(cin, 4 * p_out)               # (cin, N*H*W), quadrant-major
        pos = _pos_grid(n_img, ho, wo)
    else:
        x_in = x_cnhw.reshape(cin, n_img * h * w)          # (cin, N*H*W)
        pos = _pos_grid(n_img, h, w)

    bf16 = jnp.bfloat16
    w1 = p["w1"].reshape(exp, cin).astype(bf16)            # MXU operands in bf16 (f32 accum)
    w3 = p["w3"].reshape(cout, exp).astype(bf16)
    w2 = p["w2"].reshape(exp, 9)                           # depthwise weights stay f32 (VPU)
    # Pack the per-channel conv-bias / BN gamma / BN beta params into two (C, k) arrays.
    pp1 = jnp.stack([p["b1"], p["g1"], p["be1"], p["b2"], p["g2"], p["be2"]], axis=1)
    if has_shortcut:
        pp3 = jnp.stack([p["b3"], p["g3"], p["be3"],
                         p["bsc"], p["gsc"], p["besc"]], axis=1)
    else:
        pp3 = jnp.stack([p["b3"], p["g3"], p["be3"]], axis=1)

    inputs = [x_in, pos, w1, w2, w3, pp1, pp3]
    if has_shortcut:
        inputs.append(p["wsc"].reshape(cout, cin).astype(bf16))

    in_specs = [pl.BlockSpec(a.shape, lambda i, nd=a.ndim: (0,) * nd) for a in inputs]

    out_flat = pl.pallas_call(
        kernel,
        out_shape=jax.ShapeDtypeStruct((cout, p_out), jnp.float32),  # lane-dense slab
        grid=(1,),
        in_specs=in_specs,
        out_specs=pl.BlockSpec((cout, p_out), lambda i: (0, 0)),
        compiler_params=pltpu.CompilerParams(
            dimension_semantics=("arbitrary",),
            vmem_limit_bytes=_vmem_limit_bytes()),
    )(*inputs)
    return out_flat.reshape(cout, n_img, ho, wo)


# ----------------------------------------------------------------------------
# BottleNeckBlock forward (layout glue in plain JAX, compute fused in Pallas)
# ----------------------------------------------------------------------------
def bottleneck_block_forward(params, x_nchw, *, n, s):
    x = jnp.transpose(x_nchw, (1, 0, 2, 3))                # NCHW -> (C, N, H, W)
    out = bottleneck_pallas(params["first"], x, s=s)
    for _ in range(n - 1):                                 # PyTorch reuses self.other (shared weights)
        out = bottleneck_pallas(params["other"], out, s=1)
    return jnp.transpose(out, (1, 0, 2, 3))                # (C, N, H, W) -> NCHW


# ----------------------------------------------------------------------------
# Deterministic parameter init (shapes follow the PyTorch module __init__)
# ----------------------------------------------------------------------------
def init_bottleneck(key, in_c, out_c, t, s):
    expanded = int(in_c * t)
    ks = iter(jax.random.split(key, 16))

    def nrm(shape, scale):
        return scale * jax.random.normal(next(ks), shape, jnp.float32)

    p = {
        "w1": nrm((expanded, in_c, 1, 1), 1.0 / (in_c ** 0.5)),
        "b1": nrm((expanded,), 0.05),
        "g1": 1.0 + nrm((expanded,), 0.1),
        "be1": nrm((expanded,), 0.1),
        "w2": nrm((expanded, 1, 3, 3), 1.0 / 3.0),
        "b2": nrm((expanded,), 0.05),
        "g2": 1.0 + nrm((expanded,), 0.1),
        "be2": nrm((expanded,), 0.1),
        "w3": nrm((out_c, expanded, 1, 1), 1.0 / (expanded ** 0.5)),
        "b3": nrm((out_c,), 0.05),
        "g3": 1.0 + nrm((out_c,), 0.1),
        "be3": nrm((out_c,), 0.1),
        "has_shortcut": (s != 1 or in_c != out_c),
    }
    if p["has_shortcut"]:
        p["wsc"] = nrm((out_c, in_c, 1, 1), 1.0 / (in_c ** 0.5))
        p["bsc"] = nrm((out_c,), 0.05)
        p["gsc"] = 1.0 + nrm((out_c,), 0.1)
        p["besc"] = nrm((out_c,), 0.1)
    return p


if __name__ == "__main__":
    # BottleNeckBlock(in_c=4, out_c=8, t=2, n=2, s=2)
    in_c, out_c, t, n, s = 4, 8, 2, 2, 2
    N, H, W = 2, 16, 16

    key = jax.random.PRNGKey(0)
    kx, kf, ko = jax.random.split(key, 3)
    x_nchw = jax.random.normal(kx, (N, in_c, H, W), jnp.float32)

    params = {
        "first": init_bottleneck(kf, in_c, out_c, t, s),
        "other": init_bottleneck(ko, out_c, out_c, t, 1),
    }

    out = bottleneck_block_forward(params, x_nchw, n=n, s=s)
    out = jax.block_until_ready(out)

    assert out.shape == (N, out_c, H // s, W // s), out.shape
    assert bool(jnp.all(jnp.isfinite(out)))
    print("KERNEL_OK")
</pallas_src>

<mosaic_0001>
module attributes {stable_mosaic.version = 11 : i64} {
  func.func @kernel(%arg0: i32, %arg1: memref<4x512xf32, #tpu.memory_space<vmem>>, %arg2: memref<2x128xi32, #tpu.memory_space<vmem>>, %arg3: memref<8x4xbf16, #tpu.memory_space<vmem>>, %arg4: memref<8x9xf32, #tpu.memory_space<vmem>>, %arg5: memref<8x8xbf16, #tpu.memory_space<vmem>>, %arg6: memref<8x6xf32, #tpu.memory_space<vmem>>, %arg7: memref<8x6xf32, #tpu.memory_space<vmem>>, %arg8: memref<8x4xbf16, #tpu.memory_space<vmem>>, %arg9: memref<8x128xf32, #tpu.memory_space<vmem>>) attributes {dimension_semantics = [#tpu.dimension_semantics<arbitrary>], iteration_bounds = array<i64: 1>, scalar_prefetch = 0 : i64, scratch_operands = 0 : i64, tpu.core_type = #tpu.core_type<tc>, window_params = [{pipeline_mode = #tpu.pipeline_mode<synchronous>, transform_indices = @transform_0, window_bounds = array<i64: 4, 512>}, {pipeline_mode = #tpu.pipeline_mode<synchronous>, transform_indices = @transform_1, window_bounds = array<i64: 2, 128>}, {pipeline_mode = #tpu.pipeline_mode<synchronous>, transform_indices = @transform_2, window_bounds = array<i64: 8, 4>}, {pipeline_mode = #tpu.pipeline_mode<synchronous>, transform_indices = @transform_3, window_bounds = array<i64: 8, 9>}, {pipeline_mode = #tpu.pipeline_mode<synchronous>, transform_indices = @transform_4, window_bounds = array<i64: 8, 8>}, {pipeline_mode = #tpu.pipeline_mode<synchronous>, transform_indices = @transform_5, window_bounds = array<i64: 8, 6>}, {pipeline_mode = #tpu.pipeline_mode<synchronous>, transform_indices = @transform_6, window_bounds = array<i64: 8, 6>}, {pipeline_mode = #tpu.pipeline_mode<synchronous>, transform_indices = @transform_7, window_bounds = array<i64: 8, 4>}, {pipeline_mode = #tpu.pipeline_mode<synchronous>, transform_indices = @transform_8, window_bounds = array<i64: 8, 128>}]} {
    %c0 = arith.constant 0 : index
    %c0_0 = arith.constant 0 : index
    %0 = vector.load %arg1[%c0, %c0_0] : memref<4x512xf32, #tpu.memory_space<vmem>>, vector<4x512xf32>
    %1 = arith.truncf %0 : vector<4x512xf32> to vector<4x512xbf16>
    %c0_1 = arith.constant 0 : index
    %c0_2 = arith.constant 0 : index
    %2 = vector.load %arg6[%c0_1, %c0_2] : memref<8x6xf32, #tpu.memory_space<vmem>>, vector<8x6xf32>
    %c0_3 = arith.constant 0 : index
    %c0_4 = arith.constant 0 : index
    %3 = vector.load %arg7[%c0_3, %c0_4] : memref<8x6xf32, #tpu.memory_space<vmem>>, vector<8x6xf32>
    %c0_5 = arith.constant 0 : index
    %c0_6 = arith.constant 0 : index
    %4 = vector.load %arg4[%c0_5, %c0_6] : memref<8x9xf32, #tpu.memory_space<vmem>>, vector<8x9xf32>
    %c0_7 = arith.constant 0 : index
    %c0_8 = arith.constant 0 : index
    %5 = vector.load %arg3[%c0_7, %c0_8] : memref<8x4xbf16, #tpu.memory_space<vmem>>, vector<8x4xbf16>
    %cst = arith.constant dense<0.000000e+00> : vector<8x512xf32>
    %6 = tpu.matmul %5, %1, %cst {dimension_numbers = #tpu.dot_dimension_numbers<[1], [0], [0], [1], [0, 0, 1, 1], [], []>} : vector<8x4xbf16>, vector<4x512xbf16>, vector<8x512xf32> -> vector<8x512xf32>
    %7 = vector.extract_strided_slice %2 {offsets = [0, 0], sizes = [8, 1], strides = [1, 1]} : vector<8x6xf32> to vector<8x1xf32>
    %8 = vector.broadcast %7 : vector<8x1xf32> to vector<8x512xf32>
    %9 = arith.addf %6, %8 : vector<8x512xf32>
    %10 = vector.extract_strided_slice %2 {offsets = [0, 1], sizes = [8, 1], strides = [1, 1]} : vector<8x6xf32> to vector<8x1xf32>
    %11 = vector.extract_strided_slice %2 {offsets = [0, 2], sizes = [8, 1], strides = [1, 1]} : vector<8x6xf32> to vector<8x1xf32>
    %cst_9 = arith.constant dense<0.000000e+00> : vector<8xf32>
    %12 = vector.multi_reduction <add>, %9, %cst_9 [1] : vector<8x512xf32> to vector<8xf32>
    %13 = vector.shape_cast %12 : vector<8xf32> to vector<8x1xf32>
    %cst_10 = arith.constant 0.001953125 : f32
    %14 = vector.broadcast %cst_10 : f32 to vector<8x1xf32>
    %15 = arith.mulf %13, %14 : vector<8x1xf32>
    %16 = vector.broadcast %15 : vector<8x1xf32> to vector<8x512xf32>
    %17 = arith.subf %9, %16 : vector<8x512xf32>
    %18 = arith.mulf %17, %17 : vector<8x512xf32>
    %cst_11 = arith.constant dense<0.000000e+00> : vector<8xf32>
    %19 = vector.multi_reduction <add>, %18, %cst_11 [1] : vector<8x512xf32> to vector<8xf32>
    %20 = vector.shape_cast %19 : vector<8xf32> to vector<8x1xf32>
    %cst_12 = arith.constant 0.001953125 : f32
    %21 = vector.broadcast %cst_12 : f32 to vector<8x1xf32>
    %22 = arith.mulf %20, %21 : vector<8x1xf32>
    %cst_13 = arith.constant 9.99999974E-6 : f32
    %23 = vector.broadcast %cst_13 : f32 to vector<8x1xf32>
    %24 = arith.addf %22, %23 : vector<8x1xf32>
    %25 = math.rsqrt %24 : vector<8x1xf32>
    %26 = arith.mulf %10, %25 : vector<8x1xf32>
    %27 = vector.broadcast %26 : vector<8x1xf32> to vector<8x512xf32>
    %28 = arith.mulf %17, %27 : vector<8x512xf32>
    %29 = vector.broadcast %11 : vector<8x1xf32> to vector<8x512xf32>
    %30 = arith.addf %28, %29 : vector<8x512xf32>
    %cst_14 = arith.constant 0.000000e+00 : f32
    %cst_15 = arith.constant 6.000000e+00 : f32
    %31 = vector.broadcast %cst_14 : f32 to vector<8x512xf32>
    %32 = arith.maximumf %31, %30 : vector<8x512xf32>
    %33 = vector.broadcast %cst_15 : f32 to vector<8x512xf32>
    %34 = arith.minimumf %33, %32 : vector<8x512xf32>
    %c0_16 = arith.constant 0 : index
    %c0_17 = arith.constant 0 : index
    %35 = vector.load %arg2[%c0_16, %c0_17] : memref<2x128xi32, #tpu.memory_space<vmem>>, vector<1x128xi32>
    %c1 = arith.constant 1 : index
    %c0_18 = arith.constant 0 : index
    %36 = vector.load %arg2[%c1, %c0_18] : memref<2x128xi32, #tpu.memory_space<vmem>>, vector<1x128xi32>
    %c1_i32 = arith.constant 1 : i32
    %37 = vector.broadcast %c1_i32 : i32 to vector<1x128xi32>
    %38 = arith.cmpi sge, %35, %37 : vector<1x128xi32>
    %c1_i32_19 = arith.constant 1 : i32
    %39 = vector.broadcast %c1_i32_19 : i32 to vector<1x128xi32>
    %40 = arith.cmpi sge, %36, %39 : vector<1x128xi32>
    %41 = vector.extract_strided_slice %34 {offsets = [0, 384], sizes = [8, 128], strides = [1, 1]} : vector<8x512xf32> to vector<8x128xf32>
    %42 = vector.extract_strided_slice %41 {offsets = [0, 119], sizes = [8, 9], strides = [1, 1]} : vector<8x128xf32> to vector<8x9xf32>
    %43 = vector.extract_strided_slice %41 {offsets = [0, 0], sizes = [8, 119], strides = [1, 1]} : vector<8x128xf32> to vector<8x119xf32>
    %44 = tpu.concatenate %42, %43 in 1 : vector<8x9xf32>, vector<8x119xf32> -> vector<8x128xf32>
    %45 = arith.andi %38, %40 : vector<1x128xi1>
    %cst_20 = arith.constant 0.000000e+00 : f32
    %46 = vector.shape_cast %45 : vector<1x128xi1> to vector<1x128xi1>
    %47 = vector.broadcast %46 : vector<1x128xi1> to vector<8x128xi1>
    %48 = vector.broadcast %cst_20 : f32 to vector<8x128xf32>
    %49 = arith.select %47, %44, %48 : vector<8x128xi1>, vector<8x128xf32>
    %50 = vector.extract_strided_slice %4 {offsets = [0, 0], sizes = [8, 1], strides = [1, 1]} : vector<8x9xf32> to vector<8x1xf32>
    %51 = vector.broadcast %50 : vector<8x1xf32> to vector<8x128xf32>
    %52 = arith.mulf %51, %49 : vector<8x128xf32>
    %53 = vector.extract_strided_slice %34 {offsets = [0, 256], sizes = [8, 128], strides = [1, 1]} : vector<8x512xf32> to vector<8x128xf32>
    %54 = vector.extract_strided_slice %53 {offsets = [0, 120], sizes = [8, 8], strides = [1, 1]} : vector<8x128xf32> to vector<8x8xf32>
    %55 = vector.extract_strided_slice %53 {offsets = [0, 0], sizes = [8, 120], strides = [1, 1]} : vector<8x128xf32> to vector<8x120xf32>
    %56 = tpu.concatenate %54, %55 in 1 : vector<8x8xf32>, vector<8x120xf32> -> vector<8x128xf32>
    %cst_21 = arith.constant 0.000000e+00 : f32
    %57 = vector.shape_cast %38 : vector<1x128xi1> to vector<1x128xi1>
    %58 = vector.broadcast %57 : vector<1x128xi1> to vector<8x128xi1>
    %59 = vector.broadcast %cst_21 : f32 to vector<8x128xf32>
    %60 = arith.select %58, %56, %59 : vector<8x128xi1>, vector<8x128xf32>
    %61 = vector.extract_strided_slice %4 {offsets = [0, 1], sizes = [8, 1], strides = [1, 1]} : vector<8x9xf32> to vector<8x1xf32>
    %62 = vector.broadcast %61 : vector<8x1xf32> to vector<8x128xf32>
    %63 = arith.mulf %62, %60 : vector<8x128xf32>
    %64 = vector.extract_strided_slice %34 {offsets = [0, 384], sizes = [8, 128], strides = [1, 1]} : vector<8x512xf32> to vector<8x128xf32>
    %65 = vector.extract_strided_slice %64 {offsets = [0, 120], sizes = [8, 8], strides = [1, 1]} : vector<8x128xf32> to vector<8x8xf32>
    %66 = vector.extract_strided_slice %64 {offsets = [0, 0], sizes = [8, 120], strides = [1, 1]} : vector<8x128xf32> to vector<8x120xf32>
    %67 = tpu.concatenate %65, %66 in 1 : vector<8x8xf32>, vector<8x120xf32> -> vector<8x128xf32>
    %cst_22 = arith.constant 0.000000e+00 : f32
    %68 = vector.shape_cast %38 : vector<1x128xi1> to vector<1x128xi1>
    %69 = vector.broadcast %68 : vector<1x128xi1> to vector<8x128xi1>
    %70 = vector.broadcast %cst_22 : f32 to vector<8x128xf32>
    %71 = arith.select %69, %67, %70 : vector<8x128xi1>, vector<8x128xf32>
    %72 = vector.extract_strided_slice %4 {offsets = [0, 2], sizes = [8, 1], strides = [1, 1]} : vector<8x9xf32> to vector<8x1xf32>
    %73 = vector.broadcast %72 : vector<8x1xf32> to vector<8x128xf32>
    %74 = arith.mulf %73, %71 : vector<8x128xf32>
    %75 = vector.extract_strided_slice %34 {offsets = [0, 128], sizes = [8, 128], strides = [1, 1]} : vector<8x512xf32> to vector<8x128xf32>
    %76 = vector.extract_strided_slice %75 {offsets = [0, 127], sizes = [8, 1], strides = [1, 1]} : vector<8x128xf32> to vector<8x1xf32>
    %77 = vector.extract_strided_slice %75 {offsets = [0, 0], sizes = [8, 127], strides = [1, 1]} : vector<8x128xf32> to vector<8x127xf32>
    %78 = tpu.concatenate %76, %77 in 1 : vector<8x1xf32>, vector<8x127xf32> -> vector<8x128xf32>
    %cst_23 = arith.constant 0.000000e+00 : f32
    %79 = vector.shape_cast %40 : vector<1x128xi1> to vector<1x128xi1>
    %80 = vector.broadcast %79 : vector<1x128xi1> to vector<8x128xi1>
    %81 = vector.broadcast %cst_23 : f32 to vector<8x128xf32>
    %82 = arith.select %80, %78, %81 : vector<8x128xi1>, vector<8x128xf32>
    %83 = vector.extract_strided_slice %4 {offsets = [0, 3], sizes = [8, 1], strides = [1, 1]} : vector<8x9xf32> to vector<8x1xf32>
    %84 = vector.broadcast %83 : vector<8x1xf32> to vector<8x128xf32>
    %85 = arith.mulf %84, %82 : vector<8x128xf32>
    %86 = vector.extract_strided_slice %34 {offsets = [0, 0], sizes = [8, 128], strides = [1, 1]} : vector<8x512xf32> to vector<8x128xf32>
    %87 = vector.extract_strided_slice %4 {offsets = [0, 4], sizes = [8, 1], strides = [1, 1]} : vector<8x9xf32> to vector<8x1xf32>
    %88 = vector.broadcast %87 : vector<8x1xf32> to vector<8x128xf32>
    %89 = arith.mulf %88, %86 : vector<8x128xf32>
    %90 = vector.extract_strided_slice %34 {offsets = [0, 128], sizes = [8, 128], strides = [1, 1]} : vector<8x512xf32> to vector<8x128xf32>
    %91 = vector.extract_strided_slice %4 {offsets = [0, 5], sizes = [8, 1], strides = [1, 1]} : vector<8x9xf32> to vector<8x1xf32>
    %92 = vector.broadcast %91 : vector<8x1xf32> to vector<8x128xf32>
    %93 = arith.mulf %92, %90 : vector<8x128xf32>
    %94 = vector.extract_strided_slice %34 {offsets = [0, 384], sizes = [8, 128], strides = [1, 1]} : vector<8x512xf32> to vector<8x128xf32>
    %95 = vector.extract_strided_slice %94 {offsets = [0, 127], sizes = [8, 1], strides = [1, 1]} : vector<8x128xf32> to vector<8x1xf32>
    %96 = vector.extract_strided_slice %94 {offsets = [0, 0], sizes = [8, 127], strides = [1, 1]} : vector<8x128xf32> to vector<8x127xf32>
    %97 = tpu.concatenate %95, %96 in 1 : vector<8x1xf32>, vector<8x127xf32> -> vector<8x128xf32>
    %cst_24 = arith.constant 0.000000e+00 : f32
    %98 = vector.shape_cast %40 : vector<1x128xi1> to vector<1x128xi1>
    %99 = vector.broadcast %98 : vector<1x128xi1> to vector<8x128xi1>
    %100 = vector.broadcast %cst_24 : f32 to vector<8x128xf32>
    %101 = arith.select %99, %97, %100 : vector<8x128xi1>, vector<8x128xf32>
    %102 = vector.extract_strided_slice %4 {offsets = [0, 6], sizes = [8, 1], strides = [1, 1]} : vector<8x9xf32> to vector<8x1xf32>
    %103 = vector.broadcast %102 : vector<8x1xf32> to vector<8x128xf32>
    %104 = arith.mulf %103, %101 : vector<8x128xf32>
    %105 = vector.extract_strided_slice %34 {offsets = [0, 256], sizes = [8, 128], strides = [1, 1]} : vector<8x512xf32> to vector<8x128xf32>
    %106 = vector.extract_strided_slice %4 {offsets = [0, 7], sizes = [8, 1], strides = [1, 1]} : vector<8x9xf32> to vector<8x1xf32>
    %107 = vector.broadcast %106 : vector<8x1xf32> to vector<8x128xf32>
    %108 = arith.mulf %107, %105 : vector<8x128xf32>
    %109 = vector.extract_strided_slice %34 {offsets = [0, 384], sizes = [8, 128], strides = [1, 1]} : vector<8x512xf32> to vector<8x128xf32>
    %110 = vector.extract_strided_slice %4 {offsets = [0, 8], sizes = [8, 1], strides = [1, 1]} : vector<8x9xf32> to vector<8x1xf32>
    %111 = vector.broadcast %110 : vector<8x1xf32> to vector<8x128xf32>
    %112 = arith.mulf %111, %109 : vector<8x128xf32>
    %113 = arith.addf %52, %63 : vector<8x128xf32>
    %114 = arith.addf %74, %85 : vector<8x128xf32>
    %115 = arith.addf %89, %93 : vector<8x128xf32>
    %116 = arith.addf %104, %108 : vector<8x128xf32>
    %117 = arith.addf %113, %114 : vector<8x128xf32>
    %118 = arith.addf %115, %116 : vector<8x128xf32>
    %119 = arith.addf %117, %118 : vector<8x128xf32>
    %120 = arith.addf %119, %112 : vector<8x128xf32>
    %121 = vector.extract_strided_slice %2 {offsets = [0, 3], sizes = [8, 1], strides = [1, 1]} : vector<8x6xf32> to vector<8x1xf32>
    %122 = vector.broadcast %121 : vector<8x1xf32> to vector<8x128xf32>
    %123 = arith.addf %120, %122 : vector<8x128xf32>
    %124 = vector.extract_strided_slice %2 {offsets = [0, 4], sizes = [8, 1], strides = [1, 1]} : vector<8x6xf32> to vector<8x1xf32>
    %125 = vector.extract_strided_slice %2 {offsets = [0, 5], sizes = [8, 1], strides = [1, 1]} : vector<8x6xf32> to vector<8x1xf32>
    %cst_25 = arith.constant dense<0.000000e+00> : vector<8xf32>
    %126 = vector.multi_reduction <add>, %123, %cst_25 [1] : vector<8x128xf32> to vector<8xf32>
    %127 = vector.shape_cast %126 : vector<8xf32> to vector<8x1xf32>
    %cst_26 = arith.constant 7.812500e-03 : f32
    %128 = vector.broadcast %cst_26 : f32 to vector<8x1xf32>
    %129 = arith.mulf %127, %128 : vector<8x1xf32>
    %130 = vector.broadcast %129 : vector<8x1xf32> to vector<8x128xf32>
    %131 = arith.subf %123, %130 : vector<8x128xf32>
    %132 = arith.mulf %131, %131 : vector<8x128xf32>
    %cst_27 = arith.constant dense<0.000000e+00> : vector<8xf32>
    %133 = vector.multi_reduction <add>, %132, %cst_27 [1] : vector<8x128xf32> to vector<8xf32>
    %134 = vector.shape_cast %133 : vector<8xf32> to vector<8x1xf32>
    %cst_28 = arith.constant 7.812500e-03 : f32
    %135 = vector.broadcast %cst_28 : f32 to vector<8x1xf32>
    %136 = arith.mulf %134, %135 : vector<8x1xf32>
    %cst_29 = arith.constant 9.99999974E-6 : f32
    %137 = vector.broadcast %cst_29 : f32 to vector<8x1xf32>
    %138 = arith.addf %136, %137 : vector<8x1xf32>
    %139 = math.rsqrt %138 : vector<8x1xf32>
    %140 = arith.mulf %124, %139 : vector<8x1xf32>
    %141 = vector.broadcast %140 : vector<8x1xf32> to vector<8x128xf32>
    %142 = arith.mulf %131, %141 : vector<8x128xf32>
    %143 = vector.broadcast %125 : vector<8x1xf32> to vector<8x128xf32>
    %144 = arith.addf %142, %143 : vector<8x128xf32>
    %cst_30 = arith.constant 0.000000e+00 : f32
    %cst_31 = arith.constant 6.000000e+00 : f32
    %145 = vector.broadcast %cst_30 : f32 to vector<8x128xf32>
    %146 = arith.maximumf %145, %144 : vector<8x128xf32>
    %147 = vector.broadcast %cst_31 : f32 to vector<8x128xf32>
    %148 = arith.minimumf %147, %146 : vector<8x128xf32>
    %c0_32 = arith.constant 0 : index
    %c0_33 = arith.constant 0 : index
    %149 = vector.load %arg5[%c0_32, %c0_33] : memref<8x8xbf16, #tpu.memory_space<vmem>>, vector<8x8xbf16>
    %150 = arith.truncf %148 : vector<8x128xf32> to vector<8x128xbf16>
    %cst_34 = arith.constant dense<0.000000e+00> : vector<8x128xf32>
    %151 = tpu.matmul %149, %150, %cst_34 {dimension_numbers = #tpu.dot_dimension_numbers<[1], [0], [0], [1], [0, 0, 1, 1], [], []>} : vector<8x8xbf16>, vector<8x128xbf16>, vector<8x128xf32> -> vector<8x128xf32>
    %152 = vector.extract_strided_slice %3 {offsets = [0, 0], sizes = [8, 1], strides = [1, 1]} : vector<8x6xf32> to vector<8x1xf32>
    %153 = vector.broadcast %152 : vector<8x1xf32> to vector<8x128xf32>
    %154 = arith.addf %151, %153 : vector<8x128xf32>
    %155 = vector.extract_strided_slice %3 {offsets = [0, 1], sizes = [8, 1], strides = [1, 1]} : vector<8x6xf32> to vector<8x1xf32>
    %156 = vector.extract_strided_slice %3 {offsets = [0, 2], sizes = [8, 1], strides = [1, 1]} : vector<8x6xf32> to vector<8x1xf32>
    %cst_35 = arith.constant dense<0.000000e+00> : vector<8xf32>
    %157 = vector.multi_reduction <add>, %154, %cst_35 [1] : vector<8x128xf32> to vector<8xf32>
    %158 = vector.shape_cast %157 : vector<8xf32> to vector<8x1xf32>
    %cst_36 = arith.constant 7.812500e-03 : f32
    %159 = vector.broadcast %cst_36 : f32 to vector<8x1xf32>
    %160 = arith.mulf %158, %159 : vector<8x1xf32>
    %161 = vector.broadcast %160 : vector<8x1xf32> to vector<8x128xf32>
    %162 = arith.subf %154, %161 : vector<8x128xf32>
    %163 = arith.mulf %162, %162 : vector<8x128xf32>
    %cst_37 = arith.constant dense<0.000000e+00> : vector<8xf32>
    %164 = vector.multi_reduction <add>, %163, %cst_37 [1] : vector<8x128xf32> to vector<8xf32>
    %165 = vector.shape_cast %164 : vector<8xf32> to vector<8x1xf32>
    %cst_38 = arith.constant 7.812500e-03 : f32
    %166 = vector.broadcast %cst_38 : f32 to vector<8x1xf32>
    %167 = arith.mulf %165, %166 : vector<8x1xf32>
    %cst_39 = arith.constant 9.99999974E-6 : f32
    %168 = vector.broadcast %cst_39 : f32 to vector<8x1xf32>
    %169 = arith.addf %167, %168 : vector<8x1xf32>
    %170 = math.rsqrt %169 : vector<8x1xf32>
    %171 = arith.mulf %155, %170 : vector<8x1xf32>
    %172 = vector.broadcast %171 : vector<8x1xf32> to vector<8x128xf32>
    %173 = arith.mulf %162, %172 : vector<8x128xf32>
    %174 = vector.broadcast %156 : vector<8x1xf32> to vector<8x128xf32>
    %175 = arith.addf %173, %174 : vector<8x128xf32>
    %176 = vector.extract_strided_slice %1 {offsets = [0, 0], sizes = [4, 128], strides = [1, 1]} : vector<4x512xbf16> to vector<4x128xbf16>
    %c0_40 = arith.constant 0 : index
    %c0_41 = arith.constant 0 : index
    %177 = vector.load %arg8[%c0_40, %c0_41] : memref<8x4xbf16, #tpu.memory_space<vmem>>, vector<8x4xbf16>
    %cst_42 = arith.constant dense<0.000000e+00> : vector<8x128xf32>
    %178 = tpu.matmul %177, %176, %cst_42 {dimension_numbers = #tpu.dot_dimension_numbers<[1], [0], [0], [1], [0, 0, 1, 1], [], []>} : vector<8x4xbf16>, vector<4x128xbf16>, vector<8x128xf32> -> vector<8x128xf32>
    %179 = vector.extract_strided_slice %3 {offsets = [0, 3], sizes = [8, 1], strides = [1, 1]} : vector<8x6xf32> to vector<8x1xf32>
    %180 = vector.broadcast %179 : vector<8x1xf32> to vector<8x128xf32>
    %181 = arith.addf %178, %180 : vector<8x128xf32>
    %182 = vector.extract_strided_slice %3 {offsets = [0, 4], sizes = [8, 1], strides = [1, 1]} : vector<8x6xf32> to vector<8x1xf32>
    %183 = vector.extract_strided_slice %3 {offsets = [0, 5], sizes = [8, 1], strides = [1, 1]} : vector<8x6xf32> to vector<8x1xf32>
    %cst_43 = arith.constant dense<0.000000e+00> : vector<8xf32>
    %184 = vector.multi_reduction <add>, %181, %cst_43 [1] : vector<8x128xf32> to vector<8xf32>
    %185 = vector.shape_cast %184 : vector<8xf32> to vector<8x1xf32>
    %cst_44 = arith.constant 7.812500e-03 : f32
    %186 = vector.broadcast %cst_44 : f32 to vector<8x1xf32>
    %187 = arith.mulf %185, %186 : vector<8x1xf32>
    %188 = vector.broadcast %187 : vector<8x1xf32> to vector<8x128xf32>
    %189 = arith.subf %181, %188 : vector<8x128xf32>
    %190 = arith.mulf %189, %189 : vector<8x128xf32>
    %cst_45 = arith.constant dense<0.000000e+00> : vector<8xf32>
    %191 = vector.multi_reduction <add>, %190, %cst_45 [1] : vector<8x128xf32> to vector<8xf32>
    %192 = vector.shape_cast %191 : vector<8xf32> to vector<8x1xf32>
    %cst_46 = arith.constant 7.812500e-03 : f32
    %193 = vector.broadcast %cst_46 : f32 to vector<8x1xf32>
    %194 = arith.mulf %192, %193 : vector<8x1xf32>
    %cst_47 = arith.constant 9.99999974E-6 : f32
    %195 = vector.broadcast %cst_47 : f32 to vector<8x1xf32>
    %196 = arith.addf %194, %195 : vector<8x1xf32>
    %197 = math.rsqrt %196 : vector<8x1xf32>
    %198 = arith.mulf %182, %197 : vector<8x1xf32>
    %199 = vector.broadcast %198 : vector<8x1xf32> to vector<8x128xf32>
    %200 = arith.mulf %189, %199 : vector<8x128xf32>
    %201 = vector.broadcast %183 : vector<8x1xf32> to vector<8x128xf32>
    %202 = arith.addf %200, %201 : vector<8x128xf32>
    %203 = arith.addf %175, %202 : vector<8x128xf32>
    %cst_48 = arith.constant 0.000000e+00 : f32
    %cst_49 = arith.constant 6.000000e+00 : f32
    %204 = vector.broadcast %cst_48 : f32 to vector<8x128xf32>
    %205 = arith.maximumf %204, %203 : vector<8x128xf32>
    %206 = vector.broadcast %cst_49 : f32 to vector<8x128xf32>
    %207 = arith.minimumf %206, %205 : vector<8x128xf32>
    %c0_50 = arith.constant 0 : index
    %c0_51 = arith.constant 0 : index
    %208 = vector.load %arg9[%c0_50, %c0_51] : memref<8x128xf32, #tpu.memory_space<vmem>>, vector<8x128xf32>
    tpu.vector_store %arg9[%c0_50, %c0_51], %207 {strides = array<i32>} : memref<8x128xf32, #tpu.memory_space<vmem>>, vector<8x128xf32>,
    return
  }
  func.func @transform_0(%arg0: i32) -> (i32, i32) {
    %c0_i32 = arith.constant 0 : i32
    %c0_i32_0 = arith.constant 0 : i32
    %c0_i32_1 = arith.constant 0 : i32
    return %c0_i32, %c0_i32_0 : i32, i32
  }
  func.func @transform_1(%arg0: i32) -> (i32, i32) {
    %c0_i32 = arith.constant 0 : i32
    %c0_i32_0 = arith.constant 0 : i32
    %c0_i32_1 = arith.constant 0 : i32
    return %c0_i32, %c0_i32_0 : i32, i32
  }
  func.func @transform_2(%arg0: i32) -> (i32, i32) {
    %c0_i32 = arith.constant 0 : i32
    %c0_i32_0 = arith.constant 0 : i32
    %c0_i32_1 = arith.constant 0 : i32
    return %c0_i32, %c0_i32_0 : i32, i32
  }
  func.func @transform_3(%arg0: i32) -> (i32, i32) {
    %c0_i32 = arith.constant 0 : i32
    %c0_i32_0 = arith.constant 0 : i32
    %c0_i32_1 = arith.constant 0 : i32
    return %c0_i32, %c0_i32_0 : i32, i32
  }
  func.func @transform_4(%arg0: i32) -> (i32, i32) {
    %c0_i32 = arith.constant 0 : i32
    %c0_i32_0 = arith.constant 0 : i32
    %c0_i32_1 = arith.constant 0 : i32
    return %c0_i32, %c0_i32_0 : i32, i32
  }
  func.func @transform_5(%arg0: i32) -> (i32, i32) {
    %c0_i32 = arith.constant 0 : i32
    %c0_i32_0 = arith.constant 0 : i32
    %c0_i32_1 = arith.constant 0 : i32
    return %c0_i32, %c0_i32_0 : i32, i32
  }
  func.func @transform_6(%arg0: i32) -> (i32, i32) {
    %c0_i32 = arith.constant 0 : i32
    %c0_i32_0 = arith.constant 0 : i32
    %c0_i32_1 = arith.constant 0 : i32
    return %c0_i32, %c0_i32_0 : i32, i32
  }
  func.func @transform_7(%arg0: i32) -> (i32, i32) {
    %c0_i32 = arith.constant 0 : i32
    %c0_i32_0 = arith.constant 0 : i32
    %c0_i32_1 = arith.constant 0 : i32
    return %c0_i32, %c0_i32_0 : i32, i32
  }
  func.func @transform_8(%arg0: i32) -> (i32, i32) {
    %c0_i32 = arith.constant 0 : i32
    %c0_i32_0 = arith.constant 0 : i32
    %c0_i32_1 = arith.constant 0 : i32
    return %c0_i32, %c0_i32_0 : i32, i32
  }
}

</mosaic_0001>

<bundles_post_ra>
// kernel: tpu_custom_call.1
= control target key start
LH: loop header
LB: loop body
LE: loop exit
PB: predicated region body
PF: predicated region fallthrough
CT: control target
= control target key end

     0   :  { %13 = vsyncpa [#allocation3], 0  ;;  %s855_s0 = inlined_call_operand.hbm [shape: f32[4,512], index: 0, kind: input, shape index: {}]   ;;  %s856_s1 = inlined_call_operand.hbm [shape: s32[2,128], index: 1, kind: input, shape index: {}]   ;;  %s857_s2 = inlined_call_operand.vmem [shape: bf16[8,4], index: 2, kind: input, shape index: {}]   ;;  %s858_s3 = inlined_call_operand.vmem [shape: f32[8,9], index: 3, kind: input, shape index: {}]   ;;  %s859_s4 = inlined_call_operand.vmem [shape: bf16[8,8], index: 4, kind: input, shape index: {}]   ;;  %s860_s5 = inlined_call_operand.hbm [shape: f32[8,6], index: 5, kind: input, shape index: {}]   ;;  %s861_s6 = inlined_call_operand.hbm [shape: f32[8,6], index: 6, kind: input, shape index: {}]   ;;  %s862_s7 = inlined_call_operand.vmem [shape: bf16[8,4], index: 7, kind: input, shape index: {}]   ;;  %s863_s8 = inlined_call_operand.hbm [shape: f32[8,128], index: 8, kind: output, shape index: {}]  }
   0x1   :  { %14 = vsyncpa [#allocation6], 0 }
   0x2   :  { %15 = vsyncpa [#allocation9], 0  ;;  %s33_s29 = sshll.u32 %s856_s1, 4  ;;  %s34_s29 = int_to_ptr.hbm [resolvable:$true] %s33_s29 }
   0x3   :  { %16 = vsyncpa [#allocation4], 0  ;;  %s693_s30 = smov [#allocation5]   ;;  %s22_s12 = sshll.u32 %s855_s0, 4  ;;  %s23_s12 = int_to_ptr.hbm [resolvable:$true] %s22_s12 }
   0x4   :  { %s35_s9 = sshll.u32 %s693_s30, 4  ;;  %s694_s13 = smov [#allocation2]   ;;  %s36_s9 = int_to_ptr.vmem [resolvable:$true] %s35_s9 }
   0x5   :  { %38 = dma.hbm_to_vmem [thread:$0]  %s34_s29, 32, %s36_s9, [#allocation6]  }
   0x6   :  { %s24_s14 = sshll.u32 %s694_s13, 4  ;;  %s50_s17 = sshll.u32 %s860_s5, 4  ;;  %s25_s14 = int_to_ptr.vmem [resolvable:$true] %s24_s14  ;;  %s51_s17 = int_to_ptr.hbm [resolvable:$true] %s50_s17 }
   0x7   :  { %27 = dma.hbm_to_vmem [thread:$0]  %s23_s12, 256, %s25_s14, [#allocation3]  }
   0x8   :  { %s61_s19 = sshll.u32 %s861_s6, 4  ;;  %s695_s20 = smov [#allocation7]   ;;  %s62_s19 = int_to_ptr.hbm [resolvable:$true] %s61_s19 }
   0x9   :  { %s52_s21 = sshll.u32 %s695_s20, 4  ;;  %s696_s0 = smov [#allocation8]   ;;  %s53_s21 = int_to_ptr.vmem [resolvable:$true] %s52_s21 }
   0xa   :  { %55 = dma.hbm_to_vmem [thread:$0]  %s51_s17, 128, %s53_s21, [#allocation6]  }
   0xb   :  { %s63_s22 = sshll.u32 %s696_s0, 4  ;;  %s64_s22 = int_to_ptr.vmem [resolvable:$true] %s63_s22 }
   0xc   :  { %66 = dma.hbm_to_vmem [thread:$0]  %s62_s19, 128, %s64_s22, [#allocation9]  }
   0xd   :  { %685 = dma.done.wait [#allocation3], 256  }
   0xe   :  { %686 = vsyncadd [#allocation3], 4294967040 }
   0xf   :  { %687 = dma.done.wait [#allocation6], 160  }
  0x10   :  { %688 = vsyncadd [#allocation6], 4294967136 }
  0x11   :  { %689 = dma.done.wait [#allocation9], 128  }
  0x12   :  { %690 = vsyncadd [#allocation9], 4294967168  ;;  %v697_v0 = vmov 0   ;;  %v86_v1 = vld [vmem:[#allocation2] sm:$0xff]  ;;  %v87_v2 = vld [vmem:[#allocation2 + $0x8] sm:$0xff]  ;;  %vm126_vm0 = vcmask 1041408  }
  0x13   :  { %537 = vset.pattern.permute.xlu0 %v697_v0  ;;  %90 = vst [vmem:[#allocation1] ss:$2 sm:$0xff] %v86_v1  ;;  %v768_v3 = vld [vmem:[#allocation7] sm:$0xff]  ;;  %vm122_vm1 = vcmask 31744   ;;  %v698_v52 = vmov 1   ;;  %v699_v54 = vmov 2  }
  0x14   :  { %92 = vst [vmem:[#allocation1 + $0x10] ss:$2 sm:$0xff] %v87_v2  ;;  %109 = vperm.xlu0 %537, %v768_v3   ;;  %v106_v22 = vld [vmem:[%s857_s2] sm:$0xf]  ;;  %538 = vset.pattern.permute.xlu1 %v698_v52  ;;  %v700_v55 = vmov 4   ;;  %v701_v2 = vmov 5  }
  0x15   :  { %v790_v53 = vld [vmem:[%s858_s3] sm:$0xff]  ;;  %539 = vset.pattern.permute.xlu2 %v699_v54  ;;  %s706_s3 = smov 1   ;;  %s707_s24 = smov 9   ;;  %vm388_vm14 = vcmask 1043456   ;;  %vm271_vm15 = vcmask 64512  }
  0x16   :  { %233 = vperm.xlu2 %539, %v768_v3   ;;  %s708_s25 = smov 8   ;;  %s502_s10 = sshll.u32 %s863_s8, 4  ;;  %s503_s10 = int_to_ptr.hbm [resolvable:$true] %s502_s10 }
  0x1a   :  { %v93_v4 = vld.sshfl [vmem:[#allocation1] sm:$0xff pattern:$0x75316420]  ;;  %v94_v5 = vld.sshfl [vmem:[#allocation1 + $0x8] sm:$0xff pattern:$0x75316420] }
  0x1b   :  { %v771_v6 = vpack.c.bf16 %v94_v5, %v93_v4  ;;  %v95_v7 = vld.sshfl [vmem:[#allocation1 + $0x10] sm:$0xff pattern:$0x75316420]  ;;  %v96_v8 = vld.sshfl [vmem:[#allocation1 + $0x18] sm:$0xff pattern:$0x75316420] }
  0x1c   :  { %v102_v9 = vpack.c.bf16 %v96_v8, %v95_v7  ;;  %543 = vset.pattern.permute.xlu0 %v700_v55  ;;  %v702_v7 = vmov 3   ;;  %v703_v8 = vmov 6  }
  0x1d   :  { %v114_v10 = vunpack.c.l.b16 %v771_v6  ;;  %v115_v11 = vunpack.c.h.b16 %v771_v6 }
  0x1e   :  { %v116_v12 = vunpack.c.l.b16 %v102_v9  ;;  %v117_v13 = vunpack.c.h.b16 %v102_v9  ;;  %540 = vset.pattern.permute.xlu2 %v697_v0 }
  0x1f   :  { %v118_v14 = vpack.c.b16 %v114_v10, %v114_v10  ;;  %v119_v15 = vpack.c.b16 %v115_v11, %v115_v11  ;;  %263 = vperm.xlu2 %540, %v790_v53   ;;  %v704_v10 = vmov 8  }
  0x20   :  { %v120_v16 = vpack.c.b16 %v116_v12, %v116_v12  ;;  %v121_v17 = vpack.c.b16 %v117_v13, %v117_v13 }
  0x21   :  { %v128_v18 = vsel %vm126_vm0, %v118_v14, 0  ;;  %v131_v19 = vsel %vm126_vm0, %v119_v15, 0 }
  0x22   :  { %146 = vmatpush.bf16.msra.mxu0 %v128_v18  ;;  %159 = vmatpush.bf16.msra.mxu1 %v131_v19  ;;  %v134_v20 = vsel %vm126_vm0, %v120_v16, 0  ;;  %v137_v21 = vsel %vm126_vm0, %v121_v17, 0 }
  0x23   :  { %172 = vmatpush.bf16.msra.mxu2 %v134_v20  ;;  %185 = vmatpush.bf16.msra.mxu3 %v137_v21  ;;  %v705_v21 = vmov 7  }
  0x25   :  { %514 = vmatmul.msk.bf16.vlgmr.msra.gmra.mxu0 %vm122_vm1, %v106_v22  ;;  %515 = vmatmul.msk.bf16.vlgmr.msra.gmra.mxu1 %vm122_vm1, %v106_v22 }
  0x26   :  { %516 = vmatmul.msk.bf16.vlgmr.msra.gmra.mxu2 %vm122_vm1, %v106_v22  ;;  %517 = vmatmul.msk.bf16.vlgmr.msra.gmra.mxu3 %vm122_vm1, %v106_v22 }
  0x27   :  { %541 = vset.pattern.permute.xlu2 %v699_v54 }
  0x28   :  { %286 = vperm.xlu2 %541, %v790_v53  }
  0x30   :  { %544 = vset.pattern.permute.xlu2 %v701_v2 }
  0x31   :  { %309 = vperm.xlu2 %544, %v790_v53  }
  0x39   :  { %546 = vset.pattern.permute.xlu2 %v705_v21 }
  0x70   :  { %v234_v9 = vpop.permute.xlu2 %233 }
  0x79   :  { %v806_v11 = vpop.permute.xlu2 %263 }
  0x82   :  { %v808_v12 = vpop.permute.xlu2 %286 }
  0x86   :  { %v110_v23 = vpop.permute.xlu0 %109 }
  0xa2   :  { %v148_v24 = vpop.f32.mrf.mxu0  ;;  %v161_v25 = vpop.f32.mrf.mxu1 }
  0xa3   :  { %v149_v26 = vadd.f32 %v148_v24, %v110_v23  ;;  %v162_v27 = vadd.f32 %v161_v25, %v110_v23  ;;  %v310_v25 = vpop.permute.xlu2 %309 }
  0xa5   :  { %v191_v28 = vadd.f32 %v162_v27, %v149_v26 }
  0xa9   :  { %v174_v29 = vpop.f32.mrf.mxu2  ;;  %v187_v30 = vpop.f32.mrf.mxu3 }
  0xaa   :  { %v175_v31 = vadd.f32 %v174_v29, %v110_v23  ;;  %v150_v32 = vpop.f32.mrf.mxu0  ;;  %v163_v33 = vpop.f32.mrf.mxu1  ;;  %v188_v35 = vadd.f32 %v187_v30, %v110_v23 }
  0xac   :  { %v192_v34 = vadd.f32 %v191_v28, %v175_v31 }
  0xae   :  { %v193_v36 = vadd.f32 %v192_v34, %v188_v35 }
  0xb0   :  { %194 = vadd.xlane.f32.xlu0 %v193_v36 }
  0xb1   :  { %v176_v37 = vpop.f32.mrf.mxu2  ;;  %v189_v38 = vpop.f32.mrf.mxu3 }
  0xc4   :  { %304 = vperm.xlu0 %543, %v790_v53  }
 0x123   :  { %v195_v39 = vpop.xlane.xlu0 %194 }
 0x124   :  { %v196_v40 = vmul.f32 0.001953125, %v195_v39 }
 0x126   :  { %v197_v41 = vsub.f32 %v149_v26, %v196_v40  ;;  %v198_v42 = vsub.f32 %v162_v27, %v196_v40  ;;  %v199_v43 = vsub.f32 %v175_v31, %v196_v40  ;;  %v200_v44 = vsub.f32 %v188_v35, %v196_v40  ;;  %v248_v40 = vld [vmem:[#allocation5] sm:$0x1] }
 0x127   :  { %vm250_vm5 = vcmp.ge.s32.totalorder %v248_v40, 1 }
 0x128   :  { %v201_v45 = vmul.f32 %v197_v41, %v197_v41  ;;  %v202_v46 = vmul.f32 %v198_v42, %v198_v42  ;;  %v203_v47 = vmul.f32 %v199_v43, %v199_v43  ;;  %v204_v49 = vmul.f32 %v200_v44, %v200_v44 }
 0x12a   :  { %v205_v48 = vadd.f32 %v202_v46, %v201_v45  ;;  %v272_v45 = vsel %vm250_vm5, 1, %v697_v0 }
 0x12c   :  { %v206_v50 = vadd.f32 %v205_v48, %v203_v47  ;;  %v273_v48 = vperm.slane %v272_v45, 0 }
 0x12e   :  { %v207_v51 = vadd.f32 %v206_v50, %v204_v49  ;;  %vm274_vm9 = vcmp.eq.s32.totalorder %v273_v48, 1 }
 0x130   :  { %208 = vadd.xlane.f32.xlu1 %v207_v51 }
 0x136   :  { %v305_v26 = vpop.permute.xlu0 %304 }
 0x1a3   :  { %v209_v56 = vpop.xlane.xlu1 %208 }
 0x1a4   :  { %v210_v57 = vmul.f32 0.001953125, %v209_v56 }
 0x1a6   :  { %v211_v58 = vadd.f32 1e-05, %v210_v57 }
 0x1a8   :  { %557 = vrsqrt.f32 %v211_v58  ;;  %vm218_vm3 = vweird.f32 %v211_v58 }
 0x1ae   :  { %v558_v59 = vpop.eup %557 }
 0x1af   :  { %v213_v60 = vmul.f32 %v558_v59, %v211_v58  ;;  %vm219_vm2 = vweird.f32 %v558_v59 }
 0x1b0   :  { %vm220_vm4 = vmor %vm218_vm3, %vm219_vm2 }
 0x1b1   :  { %v214_v61 = vmul.f32 %v558_v59, %v213_v60 }
 0x1b3   :  { %v215_v62 = vmul.f32 0.5, %v214_v61 }
 0x1b5   :  { %v216_v63 = vsub.f32 1.5, %v215_v62 }
 0x1b7   :  { %v217_v1 = vmul.f32 %v558_v59, %v216_v63 }
 0x1b9   :  { %v221_v4 = vsel %vm220_vm4, %v558_v59, %v217_v1 }
 0x1ba   :  { %v222_v5 = vmul.f32 %v221_v4, %v768_v3 }
 0x1bc   :  { %225 = vperm.xlu1 %538, %v222_v5  }
 0x1c4   :  { %277 = vperm.xlu1 %538, %v790_v53  }
 0x1cc   :  { %542 = vset.pattern.permute.xlu1 %v702_v7 }
 0x1cd   :  { %299 = vperm.xlu1 %542, %v790_v53  }
 0x1d5   :  { %545 = vset.pattern.permute.xlu1 %v703_v8 }
 0x1d6   :  { %318 = vperm.xlu1 %545, %v790_v53  }
 0x1de   :  { %547 = vset.pattern.permute.xlu1 %v704_v10 }
 0x22e   :  { %v226_v13 = vpop.permute.xlu1 %225 }
 0x22f   :  { %v231_v14 = vmul.f32 %v226_v13, %v200_v44  ;;  %v229_v15 = vmul.f32 %v226_v13, %v198_v42  ;;  %v228_v16 = vmul.f32 %v226_v13, %v197_v41  ;;  %v230_v17 = vmul.f32 %v226_v13, %v199_v43  ;;  %v249_v41 = vld [vmem:[#allocation5 + $0x1] sm:$0x1] }
 0x230   :  { %vm251_vm6 = vcmp.ge.s32.totalorder %v249_v41, 1  ;;  %v378_v41 = vld [vmem:[%s859_s4] sm:$0xf]  ;;  %s709_s4 = smov [#allocation10]  }
 0x231   :  { %v239_v18 = vadd.f32 %v234_v9, %v231_v14  ;;  %v237_v19 = vadd.f32 %v234_v9, %v229_v15  ;;  %v236_v20 = vadd.f32 %v234_v9, %v228_v16  ;;  %v238_v30 = vadd.f32 %v234_v9, %v230_v17  ;;  %vm256_vm7 = vmand %vm250_vm5, %vm251_vm6  ;;  %s500_s29 = sshll.u32 %s709_s4, 4  ;;  %s501_s29 = int_to_ptr.vmem [resolvable:$true] %s500_s29 }
 0x232   :  { %v294_v44 = vsel %vm251_vm6, 1, %v697_v0  ;;  %v257_v47 = vsel %vm256_vm7, 1, %v697_v0 }
 0x233   :  { %v241_v22 = vmax.f32 %v237_v19, 0.0  ;;  %v240_v23 = vmax.f32 %v236_v20, 0.0  ;;  %v243_v24 = vmax.f32 %v239_v18, 0.0  ;;  %v242_v34 = vmax.f32 %v238_v30, 0.0 }
 0x234   :  { %v295_v46 = vperm.slane %v294_v44, 0  ;;  %v258_v49 = vperm.slane %v257_v47, 0 }
 0x235   :  { %v245_v27 = vmin.f32 %v241_v22, 6.0  ;;  %v244_v28 = vmin.f32 %v240_v23, 6.0  ;;  %v247_v29 = vmin.f32 %v243_v24, 6.0  ;;  %v246_v35 = vmin.f32 %v242_v34, 6.0  ;;  %v833_v34 = vld [vmem:[#allocation8] sm:$0xff] }
 0x236   :  { %v278_v36 = vpop.permute.xlu1 %277  ;;  %vm817_vm8 = vcmp.eq.s32.totalorder %v295_v46, 1  ;;  %vm259_vm10 = vcmp.eq.s32.totalorder %v258_v49, 1 }
 0x237   :  { %v312_v31 = vmul.f32 %v310_v25, %v245_v27  ;;  %v307_v32 = vmul.f32 %v305_v26, %v244_v28  ;;  %313 = vrot.lane.b32.xlu1 %v247_v29, %s706_s3  ;;  %253 = vrot.lane.b32.xlu2 %v247_v29, %s707_s24 }
 0x239   :  { %v334_v33 = vadd.f32 %v312_v31, %v307_v32 }
 0x23f   :  { %328 = vperm.xlu1 %547, %v790_v53   ;;  %268 = vrot.lane.b32.xlu2 %v246_v35, %s708_s25  ;;  %v300_v38 = vpop.permute.xlu1 %299 }
 0x247   :  { %281 = vrot.lane.b32.xlu2 %v247_v29, %s708_s25  ;;  %551 = vset.pattern.permute.xlu1 %v702_v7 }
 0x248   :  { %v319_v43 = vpop.permute.xlu1 %318 }
 0x24f   :  { %291 = vrot.lane.b32.xlu2 %v245_v27, %s706_s3 }
 0x257   :  { %323 = vperm.xlu2 %546, %v790_v53  }
 0x25f   :  { %548 = vset.pattern.permute.xlu2 %v702_v7 }
 0x260   :  { %341 = vperm.xlu2 %548, %v768_v3  }
 0x268   :  { %552 = vset.pattern.permute.xlu2 %v700_v55 }
 0x291   :  { %v254_v37 = vpop.permute.xlu2 %253 }
 0x292   :  { %v260_v59 = vsel %vm259_vm10, %v254_v37, 0.0 }
 0x293   :  { %v266_v1 = vmul.f32 %v806_v11, %v260_v59 }
 0x299   :  { %v269_v39 = vpop.permute.xlu2 %268 }
 0x29a   :  { %v275_v56 = vsel %vm274_vm9, %v269_v39, 0.0 }
 0x29b   :  { %v280_v61 = vmul.f32 %v278_v36, %v275_v56 }
 0x29d   :  { %v332_v8 = vadd.f32 %v280_v61, %v266_v1 }
 0x2a1   :  { %v282_v42 = vpop.permute.xlu2 %281 }
 0x2a2   :  { %v284_v57 = vsel %vm274_vm9, %v282_v42, 0.0 }
 0x2a3   :  { %v289_v62 = vmul.f32 %v808_v12, %v284_v57 }
 0x2a9   :  { %v292_v51 = vpop.permute.xlu2 %291  ;;  %v314_v55 = vpop.permute.xlu1 %313 }
 0x2aa   :  { %v297_v53 = vsel %vm817_vm8, %v292_v51, 0.0  ;;  %v316_v60 = vsel %vm817_vm8, %v314_v55, 0.0 }
 0x2ab   :  { %v302_v58 = vmul.f32 %v300_v38, %v297_v53  ;;  %v321_v5 = vmul.f32 %v319_v43, %v316_v60 }
 0x2ad   :  { %v333_v4 = vadd.f32 %v302_v58, %v289_v62 }
 0x2af   :  { %v336_v13 = vadd.f32 %v333_v4, %v332_v8 }
 0x2b1   :  { %v324_v63 = vpop.permute.xlu2 %323  ;;  %v329_v10 = vpop.permute.xlu1 %328 }
 0x2b2   :  { %v326_v7 = vmul.f32 %v324_v63, %v246_v35  ;;  %v331_v15 = vmul.f32 %v329_v10, %v247_v29  ;;  %v436_v35 = vld [vmem:[%s862_s7] sm:$0xf] }
 0x2b4   :  { %v335_v9 = vadd.f32 %v326_v7, %v321_v5 }
 0x2b6   :  { %v337_v14 = vadd.f32 %v335_v9, %v334_v33  ;;  %v445_v33 = vsel %vm126_vm0, %v771_v6, 0 }
 0x2b7   :  { %454 = vmatpush.bf16.msrb.mxu1 %v445_v33 }
 0x2b8   :  { %v338_v16 = vadd.f32 %v337_v14, %v336_v13 }
 0x2ba   :  { %v342_v17 = vpop.permute.xlu2 %341  ;;  %v339_v18 = vadd.f32 %v338_v16, %v331_v15  ;;  %519 = vmatmul.msk.bf16.vlgmr.msrb.gmra.mxu1 %vm122_vm1, %v436_v35 }
 0x2bc   :  { %v344_v19 = vadd.f32 %v342_v17, %v339_v18 }
 0x2be   :  { %345 = vadd.xlane.f32.xlu1 %v344_v19 }
 0x2d7   :  { %438 = vperm.xlu1 %551, %v833_v34  }
 0x2df   :  { %553 = vset.pattern.permute.xlu1 %v699_v54 }
 0x2e0   :  { %432 = vperm.xlu1 %553, %v833_v34  }
 0x2e8   :  { %554 = vset.pattern.permute.xlu1 %v698_v52 }
 0x331   :  { %v346_v20 = vpop.xlane.xlu1 %345 }
 0x332   :  { %v347_v21 = vmul.f32 0.0078125, %v346_v20 }
 0x334   :  { %v348_v12 = vsub.f32 %v344_v19, %v347_v21 }
 0x336   :  { %v349_v22 = vmul.f32 %v348_v12, %v348_v12 }
 0x337   :  { %v456_v54 = vpop.f32.mrf.mxu1 }
 0x338   :  { %350 = vadd.xlane.f32.xlu2 %v349_v22 }
 0x33f   :  { %v458_v42 = vpop.f32.mrf.mxu1 }
 0x349   :  { %v439_v52 = vpop.permute.xlu1 %438 }
 0x34a   :  { %v457_v46 = vadd.f32 %v456_v54, %v439_v52 }
 0x3ab   :  { %v351_v11 = vpop.xlane.xlu2 %350 }
 0x3ac   :  { %v352_v23 = vmul.f32 0.0078125, %v351_v11 }
 0x3ae   :  { %v353_v24 = vadd.f32 1e-05, %v352_v23 }
 0x3b0   :  { %559 = vrsqrt.f32 %v353_v24  ;;  %vm360_vm12 = vweird.f32 %v353_v24 }
 0x3b6   :  { %v560_v25 = vpop.eup %559 }
 0x3b7   :  { %v355_v26 = vmul.f32 %v560_v25, %v353_v24  ;;  %vm361_vm11 = vweird.f32 %v560_v25 }
 0x3b8   :  { %vm362_vm13 = vmor %vm360_vm12, %vm361_vm11 }
 0x3b9   :  { %v356_v27 = vmul.f32 %v560_v25, %v355_v26 }
 0x3bb   :  { %v357_v28 = vmul.f32 0.5, %v356_v27 }
 0x3bd   :  { %v358_v30 = vsub.f32 1.5, %v357_v28 }
 0x3bf   :  { %v359_v29 = vmul.f32 %v560_v25, %v358_v30 }
 0x3c1   :  { %v363_v31 = vsel %vm362_vm13, %v560_v25, %v359_v29 }
 0x3c2   :  { %v364_v32 = vmul.f32 %v363_v31, %v768_v3 }
 0x3c4   :  { %367 = vperm.xlu0 %543, %v364_v32  }
 0x3cc   :  { %549 = vset.pattern.permute.xlu0 %v701_v2 }
 0x3cd   :  { %372 = vperm.xlu0 %549, %v768_v3  }
 0x3d5   :  { %550 = vset.pattern.permute.xlu0 %v697_v0 }
 0x3d6   :  { %382 = vperm.xlu0 %550, %v833_v34  }
 0x3de   :  { %556 = vset.pattern.permute.xlu0 %v701_v2 }
 0x436   :  { %v368_v3 = vpop.permute.xlu0 %367 }
 0x437   :  { %v370_v0 = vmul.f32 %v368_v3, %v348_v12  ;;  %v433_v12 = vpop.permute.xlu1 %432 }
 0x43f   :  { %v373_v6 = vpop.permute.xlu0 %372 }
 0x440   :  { %v375_v36 = vadd.f32 %v373_v6, %v370_v0 }
 0x442   :  { %v376_v37 = vmax.f32 %v375_v36, 0.0 }
 0x444   :  { %v377_v38 = vmin.f32 %v376_v37, 6.0 }
 0x446   :  { %v379_v39 = vpack.c.bf16 %v377_v38, %v377_v38 }
 0x448   :  { %v390_v40 = vsel %vm388_vm14, %v379_v39, 0  ;;  %v383_v43 = vpop.permute.xlu0 %382 }
 0x449   :  { %399 = vmatpush.bf16.msrb.mxu0 %v390_v40 }
 0x44c   :  { %518 = vmatmul.msk.bf16.vlgmr.msrb.gmra.mxu0 %vm271_vm15, %v378_v41 }
 0x4c9   :  { %v401_v44 = vpop.f32.mrf.mxu0 }
 0x4ca   :  { %v402_v45 = vadd.f32 %v401_v44, %v383_v43 }
 0x4cc   :  { %405 = vadd.xlane.f32.xlu2 %v402_v45 }
 0x4d1   :  { %v403_v47 = vpop.f32.mrf.mxu0 }
 0x4d4   :  { %460 = vadd.xlane.f32.xlu2 %v457_v46 }
 0x53f   :  { %v406_v48 = vpop.xlane.xlu2 %405 }
 0x540   :  { %v407_v49 = vmul.f32 0.0078125, %v406_v48 }
 0x542   :  { %v408_v50 = vsub.f32 %v402_v45, %v407_v49 }
 0x544   :  { %v409_v51 = vmul.f32 %v408_v50, %v408_v50 }
 0x546   :  { %410 = vadd.xlane.f32.xlu0 %v409_v51 }
 0x547   :  { %v461_v53 = vpop.xlane.xlu2 %460 }
 0x548   :  { %v462_v55 = vmul.f32 0.0078125, %v461_v53 }
 0x54a   :  { %v463_v56 = vsub.f32 %v457_v46, %v462_v55 }
 0x54c   :  { %v464_v57 = vmul.f32 %v463_v56, %v463_v56 }
 0x54e   :  { %465 = vadd.xlane.f32.xlu2 %v464_v57 }
 0x5b9   :  { %v411_v58 = vpop.xlane.xlu0 %410 }
 0x5ba   :  { %v412_v59 = vmul.f32 0.0078125, %v411_v58 }
 0x5bc   :  { %v413_v60 = vadd.f32 1e-05, %v412_v59 }
 0x5be   :  { %561 = vrsqrt.f32 %v413_v60  ;;  %vm420_vm1 = vweird.f32 %v413_v60 }
 0x5c1   :  { %v466_v61 = vpop.xlane.xlu2 %465 }
 0x5c2   :  { %v467_v62 = vmul.f32 0.0078125, %v466_v61 }
 0x5c4   :  { %v562_v63 = vpop.eup %561  ;;  %v468_v1 = vadd.f32 1e-05, %v467_v62 }
 0x5c5   :  { %v415_v4 = vmul.f32 %v562_v63, %v413_v60  ;;  %vm421_vm0 = vweird.f32 %v562_v63 }
 0x5c6   :  { %563 = vrsqrt.f32 %v468_v1  ;;  %vm422_vm2 = vmor %vm420_vm1, %vm421_vm0  ;;  %vm475_vm4 = vweird.f32 %v468_v1 }
 0x5c7   :  { %v416_v5 = vmul.f32 %v562_v63, %v415_v4 }
 0x5c9   :  { %v417_v7 = vmul.f32 0.5, %v416_v5 }
 0x5cb   :  { %v418_v8 = vsub.f32 1.5, %v417_v7 }
 0x5cc   :  { %v564_v9 = vpop.eup %563 }
 0x5cd   :  { %v470_v10 = vmul.f32 %v564_v9, %v468_v1  ;;  %v419_v13 = vmul.f32 %v562_v63, %v418_v8  ;;  %vm476_vm3 = vweird.f32 %v564_v9 }
 0x5ce   :  { %vm477_vm5 = vmor %vm475_vm4, %vm476_vm3 }
 0x5cf   :  { %v471_v14 = vmul.f32 %v564_v9, %v470_v10  ;;  %v423_v15 = vsel %vm422_vm2, %v562_v63, %v419_v13 }
 0x5d0   :  { %v424_v16 = vmul.f32 %v423_v15, %v833_v34 }
 0x5d1   :  { %v472_v17 = vmul.f32 0.5, %v471_v14 }
 0x5d2   :  { %427 = vperm.xlu1 %554, %v424_v16  }
 0x5d3   :  { %v473_v18 = vsub.f32 1.5, %v472_v17 }
 0x5d5   :  { %v474_v19 = vmul.f32 %v564_v9, %v473_v18 }
 0x5d7   :  { %v478_v20 = vsel %vm477_vm5, %v564_v9, %v474_v19 }
 0x5d8   :  { %v479_v21 = vmul.f32 %v478_v20, %v833_v34 }
 0x5da   :  { %555 = vset.pattern.permute.xlu1 %v701_v2  ;;  %482 = vperm.xlu2 %552, %v479_v21  }
 0x5db   :  { %487 = vperm.xlu1 %555, %v833_v34  }
 0x634   :  { %v483_v11 = vpop.permute.xlu2 %482 }
 0x635   :  { %v485_v24 = vmul.f32 %v483_v11, %v463_v56 }
 0x644   :  { %v428_v22 = vpop.permute.xlu1 %427 }
 0x645   :  { %v430_v23 = vmul.f32 %v428_v22, %v408_v50 }
 0x647   :  { %v435_v26 = vadd.f32 %v433_v12, %v430_v23 }
 0x64d   :  { %v488_v25 = vpop.permute.xlu1 %487 }
 0x64e   :  { %v490_v27 = vadd.f32 %v488_v25, %v485_v24 }
 0x650   :  { %v491_v28 = vadd.f32 %v490_v27, %v435_v26 }
 0x652   :  { %v492_v30 = vmax.f32 %v491_v28, 0.0 }
 0x654   :  { %v493_v2 = vmin.f32 %v492_v30, 6.0 }
 0x656   :  { %494 = vst [vmem:[#allocation10] sm:$0xff] %v493_v2 }
 0x657   :  { %505 = dma.vmem_to_hbm [thread:$0]  %s501_s29, 128, %s503_s10, [#allocation4]  }
 0x658   :  { %691 = dma.done.wait [#allocation4], 128  }
 0x659   :  { %692 = vsyncadd [#allocation4], 4294967168 }
 0x65a   :  { %510 = vsyncpa [#allocation3], 1 }
 0x65b   :  { %511 = vsyncpa [#allocation6], 1 }
 0x65c   :  { %512 = vsyncpa [#allocation9], 1 }
 0x65d   :  { %513 = vsyncpa [#allocation4], 1 }

</bundles_post_ra>
